<compile_context>
chip_gen: v6e
topology: v6e:2x2x1
jax: 0.10.0
libtpu: 0.0.40
codegen_flags: <defaults>
</compile_context>

<pallas_src>
import jax
import jax.numpy as jnp
from jax.experimental import pallas as pl
from jax.experimental.pallas import tpu as pltpu

# ---- small, deterministic hyperparameters consistent with the module ----
BATCH = 2
WINDOW = 24          # args.window
M = 8                # data.m (number of series)
HORIZON = 3          # args.horizon
N_MA = 2             # self.n = 2  (moving-average order)
W_FULL = 2 * WINDOW - N_MA + 1   # self.w = 2*window - n + 1 = 47


# --------------------------- the fused kernel --------------------------------
def arma_kernel(x_ref, w_ref, b_ref, o_ref):
    # x:      (B, WINDOW, M)   raw window
    # w:      (W_FULL, M)      per-(time, series) weights for [x_o ; ma]
    # b:      (1, M)           bias
    # o:      (B, HORIZON, M)  result broadcast across the horizon
    x = x_ref[...]                       # single VMEM load, stays in vregs
    w = w_ref[...]
    b = b_ref[...]

    W = x_ref.shape[1]
    w_dir = w[:W, :]                     # weights applied to the raw window
    w_ma = w[W:, :]                      # weights applied to the moving average

    # Direct (AR) part: sum_t x[b, t, f] * w_dir[t, f]
    direct = jnp.sum(x * w_dir[None, :, :], axis=1)              # (B, M)

    # Moving-average part with n = 2:  ma[j] = (x[j] + x[j+1]) / 2
    ma = 0.5 * (x[:, :-1, :] + x[:, 1:, :])                       # (B, W-1, M)
    ma_part = jnp.sum(ma * w_ma[None, :, :], axis=1)              # (B, M)

    res = direct + ma_part + b                                    # (B, M)

    # self.output is None -> no activation.  Expand across the horizon and
    # store once (single lane-masked store; output is tiny so this is fine).
    o_ref[...] = jnp.broadcast_to(res[:, None, :], o_ref.shape)


def arma_forward(x, weight, bias, horizon=HORIZON):
    """Pallas forward pass.  Returns (out, None) like the PyTorch module."""
    B, _, m = x.shape
    out = pl.pallas_call(
        arma_kernel,
        out_shape=jax.ShapeDtypeStruct((B, horizon, m), jnp.float32),
        in_specs=[pl.BlockSpec(memory_space=pltpu.MemorySpace.VMEM)] * 3,
        out_specs=pl.BlockSpec(memory_space=pltpu.MemorySpace.VMEM),
    )(x, weight, bias.reshape(1, m))
    return out, None


# ------------------------ pure-JAX reference (for checking) ------------------
def arma_reference(x, weight, bias, horizon=HORIZON, n=N_MA):
    """Literal transcription of the PyTorch forward (cumsum-based MA)."""
    B, W, m = x.shape
    xt = jnp.transpose(x, (0, 2, 1))                              # (B, m, W)
    c = jnp.cumsum(xt, axis=-1)
    c = c.at[:, :, n:].set(c[:, :, n:] - c[:, :, :-n])
    ma = c[:, :, n - 1:] / n                                      # (B, m, W-n+1)
    ma = jnp.transpose(ma, (0, 2, 1))                             # (B, W-n+1, m)
    xc = jnp.concatenate([x, ma], axis=1)                         # (B, 2W-n+1, m)
    out = jnp.sum(xc * weight, axis=1) + bias                     # (B, m)
    return jnp.broadcast_to(out[:, None, :], (B, horizon, m))


# ---------------------------------- main --------------------------------------
if __name__ == "__main__":
    key = jax.random.PRNGKey(0)
    kx, kw = jax.random.split(key, 2)

    x = jax.random.normal(kx, (BATCH, WINDOW, M), jnp.float32)
    # xavier-style small weights; bias initialized to zeros like the module.
    weight = 0.1 * jax.random.normal(kw, (W_FULL, M), jnp.float32)
    bias = jnp.zeros((M,), jnp.float32)

    out, aux = arma_forward(x, weight, bias)
    out = jax.block_until_ready(out)

    assert out.shape == (BATCH, HORIZON, M), out.shape
    assert aux is None
    assert bool(jnp.all(jnp.isfinite(out)))

    ref = arma_reference(x, weight, bias)
    assert bool(jnp.allclose(out, ref, atol=1e-5, rtol=1e-5)), (
        float(jnp.max(jnp.abs(out - ref))))

    print("KERNEL_OK")
</pallas_src>

<mosaic_0001>
module attributes {stable_mosaic.version = 11 : i64} {
  func.func @arma_kernel(%arg0: memref<2x24x8xf32, #tpu.memory_space<vmem>>, %arg1: memref<47x8xf32, #tpu.memory_space<vmem>>, %arg2: memref<1x8xf32, #tpu.memory_space<vmem>>, %arg3: memref<2x3x8xf32, #tpu.memory_space<vmem>>) attributes {dimension_semantics = [], scalar_prefetch = 0 : i64, scratch_operands = 0 : i64, tpu.core_type = #tpu.core_type<tc>} {
    %c0 = arith.constant 0 : index
    %c0_0 = arith.constant 0 : index
    %c0_1 = arith.constant 0 : index
    %0 = vector.load %arg0[%c0, %c0_0, %c0_1] : memref<2x24x8xf32, #tpu.memory_space<vmem>>, vector<2x24x8xf32>
    %c0_2 = arith.constant 0 : index
    %c0_3 = arith.constant 0 : index
    %1 = vector.load %arg1[%c0_2, %c0_3] : memref<47x8xf32, #tpu.memory_space<vmem>>, vector<47x8xf32>
    %c0_4 = arith.constant 0 : index
    %c0_5 = arith.constant 0 : index
    %2 = vector.load %arg2[%c0_4, %c0_5] : memref<1x8xf32, #tpu.memory_space<vmem>>, vector<1x8xf32>
    %3 = vector.extract_strided_slice %1 {offsets = [0, 0], sizes = [24, 8], strides = [1, 1]} : vector<47x8xf32> to vector<24x8xf32>
    %4 = vector.extract_strided_slice %1 {offsets = [24, 0], sizes = [23, 8], strides = [1, 1]} : vector<47x8xf32> to vector<23x8xf32>
    %5 = vector.shape_cast %3 : vector<24x8xf32> to vector<1x24x8xf32>
    %6 = vector.broadcast %5 : vector<1x24x8xf32> to vector<2x24x8xf32>
    %7 = arith.mulf %0, %6 : vector<2x24x8xf32>
    %cst = arith.constant dense<0.000000e+00> : vector<2x8xf32>
    %8 = vector.multi_reduction <add>, %7, %cst [1] : vector<2x24x8xf32> to vector<2x8xf32>
    %9 = vector.extract_strided_slice %0 {offsets = [0, 0, 0], sizes = [2, 23, 8], strides = [1, 1, 1]} : vector<2x24x8xf32> to vector<2x23x8xf32>
    %10 = vector.extract_strided_slice %0 {offsets = [0, 1, 0], sizes = [2, 23, 8], strides = [1, 1, 1]} : vector<2x24x8xf32> to vector<2x23x8xf32>
    %11 = arith.addf %9, %10 : vector<2x23x8xf32>
    %cst_6 = arith.constant 5.000000e-01 : f32
    %12 = vector.broadcast %cst_6 : f32 to vector<2x23x8xf32>
    %13 = arith.mulf %12, %11 : vector<2x23x8xf32>
    %14 = vector.shape_cast %4 : vector<23x8xf32> to vector<1x23x8xf32>
    %15 = vector.broadcast %14 : vector<1x23x8xf32> to vector<2x23x8xf32>
    %16 = arith.mulf %13, %15 : vector<2x23x8xf32>
    %cst_7 = arith.constant dense<0.000000e+00> : vector<2x8xf32>
    %17 = vector.multi_reduction <add>, %16, %cst_7 [1] : vector<2x23x8xf32> to vector<2x8xf32>
    %18 = arith.addf %8, %17 : vector<2x8xf32>
    %19 = vector.broadcast %2 : vector<1x8xf32> to vector<2x8xf32>
    %20 = arith.addf %18, %19 : vector<2x8xf32>
    %21 = vector.shape_cast %20 : vector<2x8xf32> to vector<2x1x8xf32>
    %22 = vector.shape_cast %21 : vector<2x1x8xf32> to vector<2x1x8xf32>
    %23 = vector.broadcast %22 : vector<2x1x8xf32> to vector<2x3x8xf32>
    %c0_8 = arith.constant 0 : index
    %c0_9 = arith.constant 0 : index
    %c0_10 = arith.constant 0 : index
    %24 = vector.load %arg3[%c0_8, %c0_9, %c0_10] : memref<2x3x8xf32, #tpu.memory_space<vmem>>, vector<2x3x8xf32>
    tpu.vector_store %arg3[%c0_8, %c0_9, %c0_10], %23 {strides = array<i32>} : memref<2x3x8xf32, #tpu.memory_space<vmem>>, vector<2x3x8xf32>,
    return
  }
}

</mosaic_0001>

<bundles_post_ra>
// kernel: tpu_custom_call.1
= control target key start
LH: loop header
LB: loop body
LE: loop exit
PB: predicated region body
PF: predicated region fallthrough
CT: control target
= control target key end

     0   :  { %vm33_vm0 = vcmask 64512   ;;  %vm62_vm1 = vcmask 1046528   ;;  %vm100_vm2 = vcmask 63488   ;;  %vm138_vm3 = vcmask 59392   ;;  %s227_s0 = inlined_call_operand.vmem [shape: f32[2,24,8], index: 0, kind: input, shape index: {}]   ;;  %s228_s1 = inlined_call_operand.vmem [shape: f32[47,8], index: 1, kind: input, shape index: {}]   ;;  %s229_s2 = inlined_call_operand.vmem [shape: f32[1,8], index: 2, kind: input, shape index: {}]   ;;  %s230_s3 = inlined_call_operand.vmem [shape: f32[2,3,8], index: 3, kind: output, shape index: {}]  }
   0x1   :  { %v14_v0 = vld [vmem:[%s227_s0] sm:$0xff]  ;;  %v15_v1 = vld [vmem:[%s227_s0 + $0x8] sm:$0xff]  ;;  %v16_v2 = vld [vmem:[%s227_s0 + $0x10] sm:$0xff] }
   0x2   :  { %v20_v3 = vld [vmem:[%s228_s1] sm:$0xff]  ;;  %v21_v4 = vld [vmem:[%s228_s1 + $0x8] sm:$0xff]  ;;  %v22_v5 = vld [vmem:[%s228_s1 + $0x10] sm:$0xff]  ;;  %v63_v6 = vrot.slane %v14_v0, 1  ;;  %v64_v7 = vrot.slane %v15_v1, 1  ;;  %v66_v8 = vrot.slane %v16_v2, 1 }
   0x3   :  { %v27_v9 = vmul.f32 %v20_v3, %v14_v0  ;;  %v28_v10 = vmul.f32 %v21_v4, %v15_v1  ;;  %v29_v11 = vmul.f32 %v22_v5, %v16_v2  ;;  %v25_v15 = vld [vmem:[%s228_s1 + $0x28] sm:$0x7f]  ;;  %v17_v20 = vld [vmem:[%s227_s0 + $0x18] sm:$0xff]  ;;  %v18_v25 = vld [vmem:[%s227_s0 + $0x20] sm:$0xff] }
   0x4   :  { %v65_v12 = vsel %vm62_vm1, %v63_v6, %v64_v7  ;;  %v67_v13 = vsel %vm62_vm1, %v64_v7, %v66_v8  ;;  %v81_v14 = vadd.f32 %v66_v8, %v16_v2  ;;  %v23_v21 = vld [vmem:[%s228_s1 + $0x18] sm:$0xff]  ;;  %v19_v26 = vld [vmem:[%s227_s0 + $0x28] sm:$0xff]  ;;  %v24_v27 = vld [vmem:[%s228_s1 + $0x20] sm:$0xff]  ;;  %v30_v29 = vmul.f32 %v20_v3, %v17_v20 }
   0x5   :  { %v34_v16 = vsel %vm33_vm0, %v27_v9, 0.0  ;;  %v35_v17 = vsel %vm33_vm0, %v28_v10, 0.0  ;;  %v37_v18 = vsel %vm33_vm0, %v29_v11, 0.0  ;;  %v79_v19 = vadd.f32 %v65_v12, %v14_v0 }
   0x6   :  { %v36_v22 = vadd.f32 %v35_v17, %v34_v16  ;;  %v80_v23 = vadd.f32 %v67_v13, %v15_v1  ;;  %v87_v24 = vmul.f32 0.5, %v81_v14  ;;  %v31_v30 = vmul.f32 %v21_v4, %v18_v25 }
   0x7   :  { %v85_v28 = vmul.f32 0.5, %v79_v19  ;;  %v32_v31 = vmul.f32 %v22_v5, %v19_v26  ;;  %v68_v35 = vrot.slane %v17_v20, 1  ;;  %v45_v37 = vsel %vm33_vm0, %v30_v29, 0.0 }
   0x8   :  { %v38_v32 = vadd.f32 %v37_v18, %v36_v22  ;;  %v86_v33 = vmul.f32 0.5, %v80_v23  ;;  %v93_v34 = vmul.f32 %v87_v24, %v25_v15  ;;  %v46_v38 = vsel %vm33_vm0, %v31_v30, 0.0  ;;  %v145_v22 = vld [vmem:[%s229_s2] ss:$0 sm:$0xff] }
   0x9   :  { %v91_v36 = vmul.f32 %v85_v28, %v23_v21  ;;  %v48_v39 = vsel %vm33_vm0, %v32_v31, 0.0  ;;  %v47_v42 = vadd.f32 %v46_v38, %v45_v37  ;;  %v69_v44 = vrot.slane %v18_v25, 1 }
   0xa   :  { %v39_v40 = vrot.slane %v38_v32, 4  ;;  %v92_v41 = vmul.f32 %v86_v33, %v24_v27  ;;  %v71_v45 = vrot.slane %v19_v26, 1  ;;  %v101_v48 = vsel %vm100_vm2, %v93_v34, 0.0 }
   0xb   :  { %v97_v43 = vsel %vm33_vm0, %v91_v36, 0.0  ;;  %v49_v49 = vadd.f32 %v48_v39, %v47_v42  ;;  %v70_v51 = vsel %vm62_vm1, %v68_v35, %v69_v44  ;;  %v130_v5 = vlaneseq }
   0xc   :  { %v40_v46 = vadd.f32 %v39_v40, %v38_v32  ;;  %v98_v47 = vsel %vm33_vm0, %v92_v41, 0.0  ;;  %v72_v52 = vsel %vm62_vm1, %v69_v44, %v71_v45  ;;  %v84_v53 = vadd.f32 %v71_v45, %v19_v26 }
   0xd   :  { %v99_v50 = vadd.f32 %v98_v47, %v97_v43  ;;  %v50_v55 = vrot.slane %v49_v49, 4  ;;  %v82_v56 = vadd.f32 %v70_v51, %v17_v20  ;;  %v83_v57 = vadd.f32 %v72_v52, %v18_v25 }
   0xe   :  { %v41_v54 = vrot.slane %v40_v46, 2  ;;  %v90_v59 = vmul.f32 0.5, %v84_v53  ;;  %v131_v16 = vshrl.u32 %v130_v5, 7 }
   0xf   :  { %v102_v58 = vadd.f32 %v101_v48, %v99_v50  ;;  %v88_v60 = vmul.f32 0.5, %v82_v56  ;;  %v89_v61 = vmul.f32 0.5, %v83_v57  ;;  %v51_v0 = vadd.f32 %v50_v55, %v49_v49 }
  0x10   :  { %v42_v62 = vadd.f32 %v41_v54, %v40_v46  ;;  %v96_v1 = vmul.f32 %v90_v59, %v25_v15  ;;  %v132_v24 = vsub.s32 0, %v131_v16 }
  0x11   :  { %v103_v63 = vrot.slane %v102_v58, 4  ;;  %v94_v2 = vmul.f32 %v88_v60, %v23_v21  ;;  %v95_v3 = vmul.f32 %v89_v61, %v24_v27  ;;  %v52_v11 = vrot.slane %v51_v0, 2 }
  0x12   :  { %v112_v8 = vsel %vm100_vm2, %v96_v1, 0.0  ;;  %v43_v9 = vrot.slane %v42_v62, 1 }
  0x13   :  { %v104_v4 = vadd.f32 %v103_v63, %v102_v58  ;;  %v109_v6 = vsel %vm33_vm0, %v94_v2, 0.0  ;;  %v110_v7 = vsel %vm33_vm0, %v95_v3, 0.0  ;;  %v53_v15 = vadd.f32 %v52_v11, %v51_v0 }
  0x14   :  { %v111_v12 = vadd.f32 %v110_v7, %v109_v6  ;;  %v44_v17 = vadd.f32 %v43_v9, %v42_v62 }
  0x15   :  { %v105_v10 = vrot.slane %v104_v4, 2  ;;  %v54_v25 = vrot.slane %v53_v15, 1 }
  0x16   :  { %v113_v14 = vadd.f32 %v112_v8, %v111_v12 }
  0x17   :  { %v106_v13 = vadd.f32 %v105_v10, %v104_v4  ;;  %v55_v30 = vadd.f32 %v54_v25, %v53_v15 }
  0x18   :  { %v114_v19 = vrot.slane %v113_v14, 4 }
  0x19   :  { %v107_v18 = vrot.slane %v106_v13, 1 }
  0x1a   :  { %v115_v21 = vadd.f32 %v114_v19, %v113_v14 }
  0x1b   :  { %v108_v20 = vadd.f32 %v107_v18, %v106_v13 }
  0x1c   :  { %v116_v26 = vrot.slane %v115_v21, 2 }
  0x1d   :  { %v120_v23 = vadd.f32 %v108_v20, %v44_v17 }
  0x1e   :  { %v117_v28 = vadd.f32 %v116_v26, %v115_v21 }
  0x1f   :  { %v128_v27 = vadd.f32 %v145_v22, %v120_v23 }
  0x20   :  { %v118_v31 = vrot.slane %v117_v28, 1 }
  0x21   :  { %v133_v29 = vrot.slane %v128_v27, %v132_v24 }
  0x22   :  { %v119_v32 = vadd.f32 %v118_v31, %v117_v28 }
  0x23   :  { %139 = vst.msk [vmem:[%s230_s3] sm:$0x7] %vm138_vm3, %v133_v29 }
  0x24   :  { %v121_v33 = vadd.f32 %v119_v32, %v55_v30 }
  0x26   :  { %v129_v34 = vadd.f32 %v145_v22, %v121_v33 }
  0x28   :  { %v137_v35 = vrot.slane %v129_v34, %v132_v24 }
  0x2a   :  { %140 = vst.msk [vmem:[%s230_s3 + $0x4] sm:$0x7] %vm138_vm3, %v137_v35 }

</bundles_post_ra>
